<compile_context>
chip_gen: v6e
topology: v6e:2x2x1
jax: 0.10.0
libtpu: 0.0.40
codegen_flags: <defaults>
</compile_context>

<pallas_src>
import jax
import jax.numpy as jnp
import numpy as np
from jax.experimental import pallas as pl
from jax.experimental.pallas import tpu as pltpu


def _pick_tile_h(H, W, cin, hidden, oup, budget_bytes=2 * 1024 * 1024):
    """Pick TH rows/tile: TH | H and TH*W % 128 == 0 (lane-dense blocks)."""
    cands = [th for th in range(1, H + 1)
             if H % th == 0 and ((th * W) % 128 == 0 or th == H)]
    per_row = (cin + 6 * hidden + 2 * oup) * W * 4        # rough f32 live bytes / row
    ok = [th for th in cands if (th + 2) * per_row <= budget_bytes]
    if not ok:
        ok = [min(cands)]
    multi = [th for th in ok if th < H]                   # prefer >=2 tiles (pipelining / megacore)
    return max(multi) if multi else max(ok)


def _make_kernel(cin, hidden, oup, W, TH, matmul_dtype):
    THW = TH * W
    WIN = (TH + 2) * W        # flattened window: [top halo row | TH rows | bottom halo row]

    def kernel(x_ref, halo_ref, w1_ref, w2_ref, w3_ref, o_ref):
        # x_ref:    (1, cin, TH*W)      tile rows, row-major flattened
        # halo_ref: (1, 1, cin, 2*W)    [top halo | bottom halo] (reflection pre-applied)
        # w1_ref:   (hidden, cin)       1x1 expand
        # w2_ref:   (9, hidden, 1)      3x3 depthwise taps, row-major (dy, dx)
        # w3_ref:   (oup, hidden)       1x1 project
        # o_ref:    (1, oup, TH*W)
        halo = halo_ref[0, 0]                                            # (cin, 2W)
        xwin = jnp.concatenate([halo[:, :W], x_ref[0], halo[:, W:]],
                               axis=-1)                                  # (cin, WIN)

        # ---- pointwise conv #1 + ReLU6  (MXU, spatial on the lane axis) ----
        w1 = w1_ref[...]
        if matmul_dtype is not None:
            w1 = w1.astype(matmul_dtype)
            xwin = xwin.astype(matmul_dtype)
        t = jnp.dot(w1, xwin, preferred_element_type=jnp.float32)        # (hidden, WIN)
        t = jnp.clip(t, 0.0, 6.0)

        # ---- width neighbours with ReflectionPad2d(1) column reflection ----
        col = jax.lax.broadcasted_iota(jnp.int32, (hidden, WIN), 1) % W
        t_m1 = jnp.concatenate([t[:, :1], t[:, :-1]], axis=-1)           # value at m-1
        t_p1 = jnp.concatenate([t[:, 1:], t[:, -1:]], axis=-1)           # value at m+1
        left = jnp.where(col == 0, t_p1, t_m1)                           # col -1 -> col 1
        right = jnp.where(col == W - 1, t_m1, t_p1)                      # col W  -> col W-2
        neigh = (left, t, right)

        # ---- depthwise 3x3 + ReLU6 (VPU; per-channel taps broadcast on lanes) ----
        w2 = w2_ref[...]                                                 # (9, hidden, 1)
        acc = jnp.zeros((hidden, THW), jnp.float32)
        for dy in range(3):
            off = dy * W
            for dx in range(3):
                acc = acc + w2[3 * dy + dx] * neigh[dx][:, off:off + THW]
        d = jnp.clip(acc, 0.0, 6.0)                                      # (hidden, THW)

        # ---- pointwise conv #2 (MXU) ----
        w3 = w3_ref[...]
        if matmul_dtype is not None:
            w3 = w3.astype(matmul_dtype)
            d = d.astype(matmul_dtype)
        out = jnp.dot(w3, d, preferred_element_type=jnp.float32)         # (oup, THW)
        o_ref[0] = out.astype(o_ref.dtype)

    return kernel


def inverted_residual_block(x, w1, w2_dw, w3, *, matmul_dtype=None):
    """Forward pass of InvertedResidualBlock (NCHW input, PyTorch-layout weights)."""
    N, cin, H, W = x.shape
    hidden = w1.shape[0]
    oup = w3.shape[0]
    assert w1.shape == (hidden, cin, 1, 1)
    assert w2_dw.shape == (hidden, 1, 3, 3)
    assert w3.shape == (oup, hidden, 1, 1)
    assert H >= 2 and W >= 2, "ReflectionPad2d(1) needs H, W >= 2"

    TH = _pick_tile_h(H, W, cin, hidden, oup)
    nH = H // TH
    THW = TH * W

    # ---- glue: layout-only reshapes + tiny halo-row gather (2 rows / tile) ----
    x_flat = x.reshape(N, cin, H * W)                                    # free (row-major)
    w1_2d = w1.reshape(hidden, cin)
    w3_2d = w3.reshape(oup, hidden)
    w2_taps = jnp.transpose(w2_dw.reshape(hidden, 9), (1, 0))[:, :, None]  # (9, hidden, 1)

    top_idx = np.array([1 if h == 0 else h * TH - 1 for h in range(nH)], np.int32)
    bot_idx = np.array([H - 2 if h == nH - 1 else h * TH + TH for h in range(nH)], np.int32)
    ht = jnp.take(x, jnp.asarray(top_idx), axis=2)                       # (N, cin, nH, W)
    hb = jnp.take(x, jnp.asarray(bot_idx), axis=2)                       # (N, cin, nH, W)
    halo = jnp.transpose(jnp.concatenate([ht, hb], axis=-1), (0, 2, 1, 3))  # (N, nH, cin, 2W)

    kernel = _make_kernel(cin, hidden, oup, W, TH, matmul_dtype)

    flops = 2 * N * H * W * (cin * hidden + 9 * hidden + hidden * oup)
    bytes_accessed = 4 * (N * cin * H * W + N * oup * H * W
                          + N * nH * cin * 2 * W
                          + hidden * cin + 9 * hidden + oup * hidden)

    out_flat = pl.pallas_call(
        kernel,
        out_shape=jax.ShapeDtypeStruct((N, oup, H * W), x.dtype),
        grid=(N, nH),
        in_specs=[
            pl.BlockSpec((1, cin, THW), lambda n, h: (n, 0, h)),
            pl.BlockSpec((1, 1, cin, 2 * W), lambda n, h: (n, h, 0, 0)),
            pl.BlockSpec((hidden, cin), lambda n, h: (0, 0)),
            pl.BlockSpec((9, hidden, 1), lambda n, h: (0, 0, 0)),
            pl.BlockSpec((oup, hidden), lambda n, h: (0, 0)),
        ],
        out_specs=pl.BlockSpec((1, oup, THW), lambda n, h: (n, 0, h)),
        compiler_params=pltpu.CompilerParams(
            dimension_semantics=("parallel", "parallel"),
            vmem_limit_bytes=32 * 1024 * 1024,
        ),
        cost_estimate=pl.CostEstimate(flops=flops, transcendentals=0,
                                      bytes_accessed=bytes_accessed),
    )(x_flat, halo, w1_2d, w2_taps, w3_2d)

    return out_flat.reshape(N, oup, H, W)


def _reference(x, w1, w2_dw, w3):
    """Pure-JAX reference matching the PyTorch module exactly (f32, HIGHEST precision)."""
    N, cin, H, W = x.shape
    hidden = w1.shape[0]
    oup = w3.shape[0]
    hp = jax.lax.Precision.HIGHEST
    t = jnp.einsum("oi,nihw->nohw", w1.reshape(hidden, cin), x, precision=hp)
    t = jnp.clip(t, 0.0, 6.0)
    tp = jnp.pad(t, ((0, 0), (0, 0), (1, 1), (1, 1)), mode="reflect")
    d = jnp.zeros_like(t)
    for dy in range(3):
        for dx in range(3):
            d = d + w2_dw[:, 0, dy, dx][None, :, None, None] * tp[:, :, dy:dy + H, dx:dx + W]
    d = jnp.clip(d, 0.0, 6.0)
    return jnp.einsum("oc,nchw->nohw", w3.reshape(oup, hidden), d, precision=hp)


if __name__ == "__main__":
    key = jax.random.PRNGKey(0)
    kx, k1, k2, k3 = jax.random.split(key, 4)

    # InvertedResidualBlock(inp=4, oup=4, expand_ratio=2) -> hidden_dim = 8
    N, inp, H, W = 2, 4, 16, 16
    oup = 4
    hidden = int(inp * 2)

    x = jax.random.normal(kx, (N, inp, H, W), dtype=jnp.float32)
    w1 = jax.random.normal(k1, (hidden, inp, 1, 1), dtype=jnp.float32) * 0.4
    w2 = jax.random.normal(k2, (hidden, 1, 3, 3), dtype=jnp.float32) * 0.4
    w3 = jax.random.normal(k3, (oup, hidden, 1, 1), dtype=jnp.float32) * 0.4

    fwd = jax.jit(inverted_residual_block)
    out = jax.block_until_ready(fwd(x, w1, w2, w3))

    ref = _reference(x, w1, w2, w3)
    assert out.shape == (N, oup, H, W)
    max_err = float(jnp.max(jnp.abs(out - ref)))
    assert jnp.allclose(out, ref, atol=1e-3, rtol=1e-3), f"max abs err = {max_err}"

    print("KERNEL_OK")
</pallas_src>

<mosaic_0001>
module attributes {stable_mosaic.version = 11 : i64} {
  func.func @kernel(%arg0: i32, %arg1: i32, %arg2: memref<1x4x128xf32, #tpu.memory_space<vmem>>, %arg3: memref<1x1x4x32xf32, #tpu.memory_space<vmem>>, %arg4: memref<8x4xf32, #tpu.memory_space<vmem>>, %arg5: memref<9x8x1xf32, #tpu.memory_space<vmem>>, %arg6: memref<4x8xf32, #tpu.memory_space<vmem>>, %arg7: memref<1x4x128xf32, #tpu.memory_space<vmem>>) attributes {dimension_semantics = [#tpu.dimension_semantics<parallel>, #tpu.dimension_semantics<parallel>], iteration_bounds = array<i64: 2, 2>, scalar_prefetch = 0 : i64, scratch_operands = 0 : i64, tpu.core_type = #tpu.core_type<tc>, window_params = [{transform_indices = @transform_0, window_bounds = array<i64: 1, 4, 128>}, {transform_indices = @transform_1, window_bounds = array<i64: 1, 1, 4, 32>}, {pipeline_mode = #tpu.pipeline_mode<synchronous>, transform_indices = @transform_2, window_bounds = array<i64: 8, 4>}, {pipeline_mode = #tpu.pipeline_mode<synchronous>, transform_indices = @transform_3, window_bounds = array<i64: 9, 8, 1>}, {pipeline_mode = #tpu.pipeline_mode<synchronous>, transform_indices = @transform_4, window_bounds = array<i64: 4, 8>}, {transform_indices = @transform_5, window_bounds = array<i64: 1, 4, 128>}]} {
    %c0 = arith.constant 0 : index
    %c0_0 = arith.constant 0 : index
    %c0_1 = arith.constant 0 : index
    %c0_2 = arith.constant 0 : index
    %0 = vector.load %arg3[%c0, %c0_0, %c0_1, %c0_2] : memref<1x1x4x32xf32, #tpu.memory_space<vmem>>, vector<1x1x4x32xf32>
    %1 = vector.shape_cast %0 : vector<1x1x4x32xf32> to vector<4x32xf32>
    %2 = vector.extract_strided_slice %1 {offsets = [0, 0], sizes = [4, 16], strides = [1, 1]} : vector<4x32xf32> to vector<4x16xf32>
    %c0_3 = arith.constant 0 : index
    %c0_4 = arith.constant 0 : index
    %c0_5 = arith.constant 0 : index
    %3 = vector.load %arg2[%c0_3, %c0_4, %c0_5] : memref<1x4x128xf32, #tpu.memory_space<vmem>>, vector<1x4x128xf32>
    %4 = vector.shape_cast %3 : vector<1x4x128xf32> to vector<4x128xf32>
    %5 = vector.extract_strided_slice %1 {offsets = [0, 16], sizes = [4, 16], strides = [1, 1]} : vector<4x32xf32> to vector<4x16xf32>
    %6 = tpu.concatenate %2, %4, %5 in 1 : vector<4x16xf32>, vector<4x128xf32>, vector<4x16xf32> -> vector<4x160xf32>
    %c0_6 = arith.constant 0 : index
    %c0_7 = arith.constant 0 : index
    %7 = vector.load %arg4[%c0_6, %c0_7] : memref<8x4xf32, #tpu.memory_space<vmem>>, vector<8x4xf32>
    %cst = arith.constant dense<0.000000e+00> : vector<8x160xf32>
    %8 = tpu.matmul %7, %6, %cst {dimension_numbers = #tpu.dot_dimension_numbers<[1], [0], [0], [1], [0, 0, 1, 1], [], []>} : vector<8x4xf32>, vector<4x160xf32>, vector<8x160xf32> -> vector<8x160xf32>
    %cst_8 = arith.constant 0.000000e+00 : f32
    %cst_9 = arith.constant 6.000000e+00 : f32
    %9 = vector.broadcast %cst_8 : f32 to vector<8x160xf32>
    %10 = arith.maximumf %9, %8 : vector<8x160xf32>
    %11 = vector.broadcast %cst_9 : f32 to vector<8x160xf32>
    %12 = arith.minimumf %11, %10 : vector<8x160xf32>
    %13 = tpu.iota {dimensions = array<i32: 1>} : vector<8x160xi32>
    %c16_i32 = arith.constant 16 : i32
    %c0_i32 = arith.constant 0 : i32
    %14 = arith.cmpi eq, %c16_i32, %c0_i32 : i32
    %c1_i32 = arith.constant 1 : i32
    %15 = arith.select %14, %c1_i32, %c16_i32 : i32
    %16 = vector.broadcast %15 : i32 to vector<8x160xi32>
    %17 = arith.remsi %13, %16 : vector<8x160xi32>
    %c0_i32_10 = arith.constant 0 : i32
    %18 = vector.broadcast %c0_i32_10 : i32 to vector<8x160xi32>
    %19 = arith.cmpi ne, %17, %18 : vector<8x160xi32>
    %c0_i32_11 = arith.constant 0 : i32
    %20 = vector.broadcast %c0_i32_11 : i32 to vector<8x160xi32>
    %21 = arith.cmpi slt, %17, %20 : vector<8x160xi32>
    %c0_i32_12 = arith.constant 0 : i32
    %22 = arith.cmpi slt, %15, %c0_i32_12 : i32
    %23 = vector.broadcast %22 : i1 to vector<8x160xi1>
    %24 = vector.broadcast %23 : vector<8x160xi1> to vector<8x160xi1>
    %25 = arith.xori %21, %24 : vector<8x160xi1>
    %26 = arith.andi %25, %19 : vector<8x160xi1>
    %27 = vector.broadcast %15 : i32 to vector<8x160xi32>
    %28 = arith.addi %17, %27 : vector<8x160xi32>
    %29 = arith.select %26, %28, %17 : vector<8x160xi1>, vector<8x160xi32>
    %30 = vector.extract_strided_slice %12 {offsets = [0, 0], sizes = [8, 1], strides = [1, 1]} : vector<8x160xf32> to vector<8x1xf32>
    %31 = vector.extract_strided_slice %12 {offsets = [0, 0], sizes = [8, 159], strides = [1, 1]} : vector<8x160xf32> to vector<8x159xf32>
    %32 = tpu.concatenate %30, %31 in 1 : vector<8x1xf32>, vector<8x159xf32> -> vector<8x160xf32>
    %33 = vector.extract_strided_slice %12 {offsets = [0, 1], sizes = [8, 159], strides = [1, 1]} : vector<8x160xf32> to vector<8x159xf32>
    %34 = vector.extract_strided_slice %12 {offsets = [0, 159], sizes = [8, 1], strides = [1, 1]} : vector<8x160xf32> to vector<8x1xf32>
    %35 = tpu.concatenate %33, %34 in 1 : vector<8x159xf32>, vector<8x1xf32> -> vector<8x160xf32>
    %c0_i32_13 = arith.constant 0 : i32
    %36 = vector.broadcast %c0_i32_13 : i32 to vector<8x160xi32>
    %37 = arith.cmpi eq, %29, %36 : vector<8x160xi32>
    %38 = arith.select %37, %35, %32 : vector<8x160xi1>, vector<8x160xf32>
    %c15_i32 = arith.constant 15 : i32
    %39 = vector.broadcast %c15_i32 : i32 to vector<8x160xi32>
    %40 = arith.cmpi eq, %29, %39 : vector<8x160xi32>
    %41 = arith.select %40, %32, %35 : vector<8x160xi1>, vector<8x160xf32>
    %c0_14 = arith.constant 0 : index
    %c0_15 = arith.constant 0 : index
    %c0_16 = arith.constant 0 : index
    %42 = vector.load %arg5[%c0_14, %c0_15, %c0_16] : memref<9x8x1xf32, #tpu.memory_space<vmem>>, vector<9x8x1xf32>
    %cst_17 = arith.constant 0.000000e+00 : f32
    %43 = vector.broadcast %cst_17 : f32 to vector<8x128xf32>
    %44 = vector.extract_strided_slice %42 {offsets = [0, 0, 0], sizes = [1, 8, 1], strides = [1, 1, 1]} : vector<9x8x1xf32> to vector<1x8x1xf32>
    %45 = vector.shape_cast %44 : vector<1x8x1xf32> to vector<8x1xf32>
    %46 = vector.extract_strided_slice %38 {offsets = [0, 0], sizes = [8, 128], strides = [1, 1]} : vector<8x160xf32> to vector<8x128xf32>
    %47 = vector.broadcast %45 : vector<8x1xf32> to vector<8x128xf32>
    %48 = arith.mulf %47, %46 : vector<8x128xf32>
    %49 = arith.addf %43, %48 : vector<8x128xf32>
    %50 = vector.extract_strided_slice %42 {offsets = [1, 0, 0], sizes = [1, 8, 1], strides = [1, 1, 1]} : vector<9x8x1xf32> to vector<1x8x1xf32>
    %51 = vector.shape_cast %50 : vector<1x8x1xf32> to vector<8x1xf32>
    %52 = vector.extract_strided_slice %12 {offsets = [0, 0], sizes = [8, 128], strides = [1, 1]} : vector<8x160xf32> to vector<8x128xf32>
    %53 = vector.broadcast %51 : vector<8x1xf32> to vector<8x128xf32>
    %54 = arith.mulf %53, %52 : vector<8x128xf32>
    %55 = arith.addf %49, %54 : vector<8x128xf32>
    %56 = vector.extract_strided_slice %42 {offsets = [2, 0, 0], sizes = [1, 8, 1], strides = [1, 1, 1]} : vector<9x8x1xf32> to vector<1x8x1xf32>
    %57 = vector.shape_cast %56 : vector<1x8x1xf32> to vector<8x1xf32>
    %58 = vector.extract_strided_slice %41 {offsets = [0, 0], sizes = [8, 128], strides = [1, 1]} : vector<8x160xf32> to vector<8x128xf32>
    %59 = vector.broadcast %57 : vector<8x1xf32> to vector<8x128xf32>
    %60 = arith.mulf %59, %58 : vector<8x128xf32>
    %61 = arith.addf %55, %60 : vector<8x128xf32>
    %62 = vector.extract_strided_slice %42 {offsets = [3, 0, 0], sizes = [1, 8, 1], strides = [1, 1, 1]} : vector<9x8x1xf32> to vector<1x8x1xf32>
    %63 = vector.shape_cast %62 : vector<1x8x1xf32> to vector<8x1xf32>
    %64 = vector.extract_strided_slice %38 {offsets = [0, 16], sizes = [8, 128], strides = [1, 1]} : vector<8x160xf32> to vector<8x128xf32>
    %65 = vector.broadcast %63 : vector<8x1xf32> to vector<8x128xf32>
    %66 = arith.mulf %65, %64 : vector<8x128xf32>
    %67 = arith.addf %61, %66 : vector<8x128xf32>
    %68 = vector.extract_strided_slice %42 {offsets = [4, 0, 0], sizes = [1, 8, 1], strides = [1, 1, 1]} : vector<9x8x1xf32> to vector<1x8x1xf32>
    %69 = vector.shape_cast %68 : vector<1x8x1xf32> to vector<8x1xf32>
    %70 = vector.extract_strided_slice %12 {offsets = [0, 16], sizes = [8, 128], strides = [1, 1]} : vector<8x160xf32> to vector<8x128xf32>
    %71 = vector.broadcast %69 : vector<8x1xf32> to vector<8x128xf32>
    %72 = arith.mulf %71, %70 : vector<8x128xf32>
    %73 = arith.addf %67, %72 : vector<8x128xf32>
    %74 = vector.extract_strided_slice %42 {offsets = [5, 0, 0], sizes = [1, 8, 1], strides = [1, 1, 1]} : vector<9x8x1xf32> to vector<1x8x1xf32>
    %75 = vector.shape_cast %74 : vector<1x8x1xf32> to vector<8x1xf32>
    %76 = vector.extract_strided_slice %41 {offsets = [0, 16], sizes = [8, 128], strides = [1, 1]} : vector<8x160xf32> to vector<8x128xf32>
    %77 = vector.broadcast %75 : vector<8x1xf32> to vector<8x128xf32>
    %78 = arith.mulf %77, %76 : vector<8x128xf32>
    %79 = arith.addf %73, %78 : vector<8x128xf32>
    %80 = vector.extract_strided_slice %42 {offsets = [6, 0, 0], sizes = [1, 8, 1], strides = [1, 1, 1]} : vector<9x8x1xf32> to vector<1x8x1xf32>
    %81 = vector.shape_cast %80 : vector<1x8x1xf32> to vector<8x1xf32>
    %82 = vector.extract_strided_slice %38 {offsets = [0, 32], sizes = [8, 128], strides = [1, 1]} : vector<8x160xf32> to vector<8x128xf32>
    %83 = vector.broadcast %81 : vector<8x1xf32> to vector<8x128xf32>
    %84 = arith.mulf %83, %82 : vector<8x128xf32>
    %85 = arith.addf %79, %84 : vector<8x128xf32>
    %86 = vector.extract_strided_slice %42 {offsets = [7, 0, 0], sizes = [1, 8, 1], strides = [1, 1, 1]} : vector<9x8x1xf32> to vector<1x8x1xf32>
    %87 = vector.shape_cast %86 : vector<1x8x1xf32> to vector<8x1xf32>
    %88 = vector.extract_strided_slice %12 {offsets = [0, 32], sizes = [8, 128], strides = [1, 1]} : vector<8x160xf32> to vector<8x128xf32>
    %89 = vector.broadcast %87 : vector<8x1xf32> to vector<8x128xf32>
    %90 = arith.mulf %89, %88 : vector<8x128xf32>
    %91 = arith.addf %85, %90 : vector<8x128xf32>
    %92 = vector.extract_strided_slice %42 {offsets = [8, 0, 0], sizes = [1, 8, 1], strides = [1, 1, 1]} : vector<9x8x1xf32> to vector<1x8x1xf32>
    %93 = vector.shape_cast %92 : vector<1x8x1xf32> to vector<8x1xf32>
    %94 = vector.extract_strided_slice %41 {offsets = [0, 32], sizes = [8, 128], strides = [1, 1]} : vector<8x160xf32> to vector<8x128xf32>
    %95 = vector.broadcast %93 : vector<8x1xf32> to vector<8x128xf32>
    %96 = arith.mulf %95, %94 : vector<8x128xf32>
    %97 = arith.addf %91, %96 : vector<8x128xf32>
    %cst_18 = arith.constant 0.000000e+00 : f32
    %cst_19 = arith.constant 6.000000e+00 : f32
    %98 = vector.broadcast %cst_18 : f32 to vector<8x128xf32>
    %99 = arith.maximumf %98, %97 : vector<8x128xf32>
    %100 = vector.broadcast %cst_19 : f32 to vector<8x128xf32>
    %101 = arith.minimumf %100, %99 : vector<8x128xf32>
    %c0_20 = arith.constant 0 : index
    %c0_21 = arith.constant 0 : index
    %102 = vector.load %arg6[%c0_20, %c0_21] : memref<4x8xf32, #tpu.memory_space<vmem>>, vector<4x8xf32>
    %cst_22 = arith.constant dense<0.000000e+00> : vector<4x128xf32>
    %103 = tpu.matmul %102, %101, %cst_22 {dimension_numbers = #tpu.dot_dimension_numbers<[1], [0], [0], [1], [0, 0, 1, 1], [], []>} : vector<4x8xf32>, vector<8x128xf32>, vector<4x128xf32> -> vector<4x128xf32>
    %c0_23 = arith.constant 0 : index
    %c0_24 = arith.constant 0 : index
    %c0_25 = arith.constant 0 : index
    %104 = vector.load %arg7[%c0_23, %c0_24, %c0_25] : memref<1x4x128xf32, #tpu.memory_space<vmem>>, vector<1x4x128xf32>
    %105 = vector.shape_cast %104 : vector<1x4x128xf32> to vector<4x128xf32>
    %106 = vector.shape_cast %103 : vector<4x128xf32> to vector<1x4x128xf32>
    tpu.vector_store %arg7[%c0_23, %c0_24, %c0_25], %106 {strides = array<i32>} : memref<1x4x128xf32, #tpu.memory_space<vmem>>, vector<1x4x128xf32>,
    return
  }
  func.func @transform_0(%arg0: i32, %arg1: i32) -> (i32, i32, i32) {
    %c0_i32 = arith.constant 0 : i32
    %c0_i32_0 = arith.constant 0 : i32
    return %arg0, %c0_i32, %arg1 : i32, i32, i32
  }
  func.func @transform_1(%arg0: i32, %arg1: i32) -> (i32, i32, i32, i32) {
    %c0_i32 = arith.constant 0 : i32
    %c0_i32_0 = arith.constant 0 : i32
    %c0_i32_1 = arith.constant 0 : i32
    return %arg0, %arg1, %c0_i32, %c0_i32_0 : i32, i32, i32, i32
  }
  func.func @transform_2(%arg0: i32, %arg1: i32) -> (i32, i32) {
    %c0_i32 = arith.constant 0 : i32
    %c0_i32_0 = arith.constant 0 : i32
    %c0_i32_1 = arith.constant 0 : i32
    return %c0_i32, %c0_i32_0 : i32, i32
  }
  func.func @transform_3(%arg0: i32, %arg1: i32) -> (i32, i32, i32) {
    %c0_i32 = arith.constant 0 : i32
    %c0_i32_0 = arith.constant 0 : i32
    %c0_i32_1 = arith.constant 0 : i32
    %c0_i32_2 = arith.constant 0 : i32
    return %c0_i32, %c0_i32_0, %c0_i32_1 : i32, i32, i32
  }
  func.func @transform_4(%arg0: i32, %arg1: i32) -> (i32, i32) {
    %c0_i32 = arith.constant 0 : i32
    %c0_i32_0 = arith.constant 0 : i32
    %c0_i32_1 = arith.constant 0 : i32
    return %c0_i32, %c0_i32_0 : i32, i32
  }
  func.func @transform_5(%arg0: i32, %arg1: i32) -> (i32, i32, i32) {
    %c0_i32 = arith.constant 0 : i32
    %c0_i32_0 = arith.constant 0 : i32
    return %arg0, %c0_i32, %arg1 : i32, i32, i32
  }
}

</mosaic_0001>

<bundles_post_ra>
// kernel: inverted_residual_block.1
= control target key start
LH: loop header
LB: loop body
LE: loop exit
PB: predicated region body
PF: predicated region fallthrough
CT: control target
= control target key end

     0   :  { %s901_s18 = smov 0   ;;  %s903_s19 = smov 0   ;;  %s1016_s0 = inlined_call_operand.vmem [shape: f32[2,4,256], index: 0, kind: input, shape index: {}]   ;;  %s1017_s1 = inlined_call_operand.vmem [shape: f32[2,2,4,32], index: 1, kind: input, shape index: {}]   ;;  %s1018_s2 = inlined_call_operand.vmem [shape: f32[8,4], index: 2, kind: input, shape index: {}]   ;;  %s1019_s3 = inlined_call_operand.vmem [shape: f32[9,8,1], index: 3, kind: input, shape index: {}]   ;;  %s1020_s4 = inlined_call_operand.vmem [shape: f32[4,8], index: 4, kind: input, shape index: {}]   ;;  %s1021_s5 = inlined_call_operand.vmem [shape: f32[2,4,256], index: 5, kind: output, shape index: {}]  }
   0x1   :  { %s905_s20 = smov 0   ;;  %s907_s21 = smov 0  }
   0x2   :  { %s909_s22 = smov 0  }
   0x3 LB: > { %s24_s23 = sadd.s32 1, %s853_s20  ;;  %s27_s24 = sadd.s32 1, %s857_s21  ;;  %s861_s22 = sphi %s909_s22, %s15_s22   ;;  %s857_s21 = sphi %s907_s21, %s1025_s21   ;;  %s853_s20 = sphi %s905_s20, %s1024_s20   ;;  %s849_s19 = sphi %s903_s19, %s1023_s19   ;;  %s845_s18 = sphi %s901_s18, %s1022_s18  }
   0x4   : > { %p25_p0 = scmp.ge.s32.totalorder %s24_s23, 2  ;;  %p753_p1 = scmp.ge.s32.totalorder %s861_s22, 1 }
   0x5   : > { %p221_p2 = scmp.lt.s32.totalorder %s861_s22, 5 }
   0x6   : > { %s1027_s23 = smov (%p25_p0, %s24_s23), 0  ;;  %s1029_s24 = smov (!%p25_p0, %s27_s24), %s857_s21 }
   0x7   : > { %p222_p3 = pnand %p753_p1, %p221_p2  ;;  %p29_p4 = scmp.ge.s32.totalorder %s1029_s24, 2 }
   0x8   : > { %p263_p5 = scmp.lt.s32.totalorder (!%p222_p3), %s849_s19, 1  ;;  %p265_p6 = scmp.lt.s32.totalorder (!%p222_p3), %s845_s18, 1 }
   0x9   : > { %s1031_s24 = smov (%p29_p4, %s1029_s24), 0  ;;  %225 = sbr.rel (%p222_p3) target bundleno = 803 (0x323), region = 40 }
   0xa   : > { %s865_s8 = smov (!%p222_p3), 16   ;;  %s866_s16 = smov (!%p222_p3), 127  }
   0xb   : > { %s867_s17 = smov (!%p222_p3), 1   ;;  %s869_s14 = smov (!%p222_p3), 96  }
   0xe   : > { %v863_v0 = vmov 0.0   ;;  %v443_v1 = vld [vmem:[%s1019_s3 + $0x20] sm:$0xff]  ;;  %s1033_s19 = smov (!%p263_p5, %s849_s19), 1  ;;  %v864_v2 = vmov 0   ;;  %s1035_s18 = smov (!%p265_p6, %s845_s18), 1  ;;  %v442_v4 = vld [vmem:[%s1019_s3 + $0x18] sm:$0xff]  ;;  %v383_v26 = vlaneseq }
   0xf   : > { %372 = vmatprep.mubr.f32.mxu0 %v863_v0  ;;  %768 = vmatprep.subr.mxu1 %v863_v0  ;;  %s754_s27 = sshll.u32 %s1033_s19, 1  ;;  %vm293_vm0 = vcmask 130048   ;;  %vm301_vm1 = vcmask 1043456   ;;  %v296_v9 = vld [vmem:[%s1018_s2] sm:$0xff]  ;;  %vm297_vm2 = vcmask 31744   ;;  %v444_v15 = vld [vmem:[%s1019_s3 + $0x28] sm:$0xff] }
  0x10   : > { %822 = vset.pattern.permute.xlu1 %v864_v2  ;;  %821 = vset.pattern.permute.xlu0 %v864_v2  ;;  %s268_s28 = sadd.s32 %s754_s27, %s1035_s18  ;;  %v446_v17 = vld [vmem:[%s1019_s3 + $0x38] sm:$0xff]  ;;  %v439_v18 = vld [vmem:[%s1019_s3] sm:$0xff]  ;;  %v445_v19 = vld [vmem:[%s1019_s3 + $0x30] sm:$0xff]  ;;  %v384_v29 = vand.u32 127, %v383_v26  ;;  %vm425_vm3 = vcmask 1039360   ;;  %vm429_vm4 = vcmask 252928  }
  0x11   : > { %488 = vperm.xlu1 %822, %v443_v1   ;;  %s936_s29 = sshll.u32 %s268_s28, 2  ;;  %v441_v20 = vld [vmem:[%s1019_s3 + $0x10] sm:$0xff]  ;;  %v447_v21 = vld [vmem:[%s1019_s3 + $0x40] sm:$0xff]  ;;  %v440_v23 = vld [vmem:[%s1019_s3 + $0x8] sm:$0xff]  ;;  %vm416_vm5 = vcmask 7168   ;;  %vm870_vm10 = vmmov 0  }
  0x12   : > { %s270_s7 = scalar_lea.vmem %s1016_s0, %s936_s29  ;;  %s278_s13 = scalar_lea.vmem %s1017_s1, %s936_s29  ;;  %v385_v31 = vadd.s32 128, %v384_v29  ;;  %v390_v33 = vand.u32 15, %v384_v29  ;;  %770 = vmatprep.mubr.msk.f32.mxu1 %vm870_vm10, %v863_v0  ;;  %vm482_vm11 = vcmask 916480   ;;  %vm531_vm12 = vcmask 785408  }
  0x13   : > { %v288_v3 = vld [vmem:[%s270_s7] sm:$0xf]  ;;  %vm570_vm13 = vcmask 64512   ;;  %s286_s19 = scalar_lea.vmem %s1021_s5, %s936_s29 }
  0x14   : > { %290 = vrot.lane.b32.xlu0 %v288_v3, %s865_s8  ;;  %v287_v5 = vld [vmem:[%s278_s13] sm:$0xf]  ;;  %s868_s13 = smov 112   ;;  %v397_v34 = vand.u32 15, %v385_v31  ;;  %vm431_vm6 = vcmp.eq.s32.totalorder %v390_v33, 0  ;;  %vm435_vm8 = vcmp.eq.s32.totalorder %v390_v33, 15 }
  0x16   : > { %vm432_vm7 = vcmp.eq.s32.totalorder %v397_v34, 0  ;;  %vm436_vm9 = vcmp.eq.s32.totalorder %v397_v34, 15 }
  0x18   : > { %471 = vperm.xlu0 %821, %v442_v4  }
  0x86   : > { %v291_v6 = vpop.permute.xlu0 %290 }
  0x87   : > { %v295_v7 = vsel %vm293_vm0, %v291_v6, %v287_v5  ;;  %v294_v8 = vsel %vm293_vm0, %v287_v5, %v291_v6 }
  0x88   : > { %760 = vmatprep.subr.msk.mxu0 %vm301_vm1, %v295_v7 }
  0x89   : > { %761 = vmatpush1.msk.msra.mxu0 %vm301_vm1, %v294_v8 }
  0x8a   : > { %762 = vmatmul.mubr.msk.f32.vlgmr.msra.gmra.mxu0 %vm297_vm2, %v296_v9 }
  0x8c   : > { %v489_v22 = vpop.permute.xlu1 %488 }
  0x93   : > { %v472_v28 = vpop.permute.xlu0 %471 }
 0x14a   : > { %v374_v10 = vpop.f32.mrf.mxu0 }
 0x14b   : > { %v379_v11 = vmax.f32 %v374_v10, 0.0 }
 0x14c   : > { %v376_v12 = vpop.f32.mrf.mxu0 }
 0x14d   : > { %v952_v13 = vmin.f32 %v379_v11, 6.0  ;;  %v380_v14 = vmax.f32 %v376_v12, 0.0 }
 0x14f   : > { %421 = vrot.lane.b32.xlu0 %v952_v13, %s866_s16  ;;  %412 = vrot.lane.b32.xlu1 %v952_v13, %s867_s17  ;;  %v382_v16 = vmin.f32 %v380_v14, 6.0  ;;  %v491_v25 = vmul.f32 %v489_v22, %v952_v13 }
 0x151   : > { %v492_v24 = vmul.f32 %v489_v22, %v382_v16 }
 0x153   : > { %504 = vperm.xlu0 %821, %v444_v15   ;;  %414 = vrot.lane.b32.xlu1 %v382_v16, %s867_s17 }
 0x157   : > { %537 = vperm.xlu0 %821, %v446_v17   ;;  %423 = vrot.lane.b32.xlu1 %v382_v16, %s866_s16 }
 0x15b   : > { %450 = vperm.xlu0 %821, %v439_v18   ;;  %520 = vperm.xlu1 %822, %v445_v19  }
 0x15f   : > { %464 = vperm.xlu0 %821, %v441_v20   ;;  %553 = vperm.xlu1 %822, %v447_v21  }
 0x163   : > { %457 = vperm.xlu1 %822, %v440_v23   ;;  %497 = vrot.lane.b32.xlu0 %v492_v24, %s868_s13 }
 0x167   : > { %495 = vrot.lane.b32.xlu1 %v491_v25, %s868_s13 }
 0x1c1   : > { %v413_v27 = vpop.permute.xlu1 %412  ;;  %v422_v32 = vpop.permute.xlu0 %421 }
 0x1c2   : > { %v420_v40 = vsel %vm416_vm5, %v952_v13, %v413_v27 }
 0x1c5   : > { %v415_v30 = vpop.permute.xlu1 %414 }
 0x1c6   : > { %v417_v41 = vsel %vm416_vm5, %v413_v27, %v415_v30 }
 0x1c9   : > { %v424_v35 = vpop.permute.xlu1 %423 }
 0x1ca   : > { %v426_v37 = vsel %vm425_vm3, %v422_v32, %v424_v35  ;;  %v430_v38 = vsel %vm429_vm4, %v424_v35, %v382_v16 }
 0x1cb   : > { %v434_v44 = vsel %vm432_vm7, %v430_v38, %v417_v41  ;;  %v433_v45 = vsel %vm431_vm6, %v426_v37, %v420_v40  ;;  %v437_v50 = vsel %vm435_vm8, %v420_v40, %v426_v37  ;;  %v438_v51 = vsel %vm436_vm9, %v417_v41, %v430_v38 }
 0x1cc   : > { %v475_v47 = vmul.f32 %v472_v28, %v434_v44  ;;  %v474_v48 = vmul.f32 %v472_v28, %v433_v45  ;;  %v569_v28 = vld [vmem:[%s1020_s4] sm:$0xf] }
 0x1ce   : > { %v505_v36 = vpop.permute.xlu0 %504 }
 0x1cf   : > { %v507_v53 = vmul.f32 %v505_v36, %v437_v50  ;;  %v508_v54 = vmul.f32 %v505_v36, %v438_v51 }
 0x1d2   : > { %v538_v39 = vpop.permute.xlu0 %537 }
 0x1d3   : > { %v540_v42 = vmul.f32 %v538_v39, %v952_v13  ;;  %v541_v43 = vmul.f32 %v538_v39, %v382_v16 }
 0x1d5   : > { %546 = vrot.lane.b32.xlu0 %v541_v43, %s869_s14  ;;  %544 = vrot.lane.b32.xlu1 %v540_v42, %s869_s14 }
 0x1d6   : > { %v521_v46 = vpop.permute.xlu1 %520  ;;  %v451_v49 = vpop.permute.xlu0 %450 }
 0x1d7   : > { %v523_v57 = vmul.f32 %v521_v46, %v433_v45  ;;  %v524_v58 = vmul.f32 %v521_v46, %v434_v44  ;;  %v453_v59 = vmul.f32 %v451_v49, %v433_v45 }
 0x1d9   : > { %480 = vrot.lane.b32.xlu0 %v475_v47, %s868_s13  ;;  %478 = vrot.lane.b32.xlu1 %v474_v48, %s868_s13 }
 0x1da   : > { %v554_v52 = vpop.permute.xlu1 %553  ;;  %v465_v55 = vpop.permute.xlu0 %464 }
 0x1db   : > { %v467_v61 = vmul.f32 %v465_v55, %v437_v50  ;;  %v556_v63 = vmul.f32 %v554_v52, %v437_v50  ;;  %v557_v1 = vmul.f32 %v554_v52, %v438_v51 }
 0x1dd   : > { %513 = vrot.lane.b32.xlu0 %v508_v54, %s868_s13  ;;  %511 = vrot.lane.b32.xlu1 %v507_v53, %s868_s13 }
 0x1de   : > { %v458_v56 = vpop.permute.xlu1 %457  ;;  %v498_v3 = vpop.permute.xlu0 %497 }
 0x1df   : > { %v460_v60 = vmul.f32 %v458_v56, %v952_v13 }
 0x1e1   : > { %v461_v62 = vadd.f32 %v460_v60, %v453_v59  ;;  %529 = vrot.lane.b32.xlu0 %v524_v58, %s869_s14  ;;  %527 = vrot.lane.b32.xlu1 %v523_v57, %s869_s14 }
 0x1e2   : > { %v496_v4 = vpop.permute.xlu1 %495 }
 0x1e3   : > { %v468_v2 = vadd.f32 %v467_v61, %v461_v62  ;;  %v499_v10 = vsel %vm482_vm11, %v496_v4, %v498_v3 }
 0x1e5   : > { %562 = vrot.lane.b32.xlu0 %v557_v1, %s869_s14  ;;  %560 = vrot.lane.b32.xlu1 %v556_v63, %s869_s14 }
 0x247   : > { %v545_v5 = vpop.permute.xlu1 %544  ;;  %v547_v6 = vpop.permute.xlu0 %546 }
 0x248   : > { %v548_v20 = vsel %vm531_vm12, %v545_v5, %v547_v6 }
 0x24b   : > { %v479_v7 = vpop.permute.xlu1 %478  ;;  %v481_v0 = vpop.permute.xlu0 %480 }
 0x24c   : > { %v483_v8 = vsel %vm482_vm11, %v479_v7, %v481_v0 }
 0x24d   : > { %v485_v9 = vadd.f32 %v483_v8, %v468_v2 }
 0x24f   : > { %v512_v11 = vpop.permute.xlu1 %511  ;;  %v501_v12 = vadd.f32 %v499_v10, %v485_v9  ;;  %v514_v13 = vpop.permute.xlu0 %513 }
 0x250   : > { %v515_v14 = vsel %vm482_vm11, %v512_v11, %v514_v13 }
 0x251   : > { %v517_v15 = vadd.f32 %v515_v14, %v501_v12 }
 0x253   : > { %v528_v16 = vpop.permute.xlu1 %527  ;;  %v530_v17 = vpop.permute.xlu0 %529 }
 0x254   : > { %v532_v18 = vsel %vm531_vm12, %v528_v16, %v530_v17 }
 0x255   : > { %v534_v19 = vadd.f32 %v532_v18, %v517_v15 }
 0x257   : > { %v561_v21 = vpop.permute.xlu1 %560  ;;  %v563_v22 = vpop.permute.xlu0 %562  ;;  %v550_v23 = vadd.f32 %v548_v20, %v534_v19 }
 0x258   : > { %v564_v24 = vsel %vm531_vm12, %v561_v21, %v563_v22 }
 0x259   : > { %v566_v25 = vadd.f32 %v564_v24, %v550_v23 }
 0x25b   : > { %v567_v26 = vmax.f32 %v566_v25, 0.0 }
 0x25d   : > { %v568_v27 = vmin.f32 %v567_v26, 6.0 }
 0x25f   : > { %769 = vmatpush3.msra.mxu1 %v568_v27 }
 0x260   : > { %771 = vmatmul.mubr.msk.f32.vlgmr.msra.gmra.mxu1 %vm570_vm13, %v569_v28 }
 0x320   : > { %v640_v29 = vpop.f32.mrf.mxu1 }
 0x321   : > { %644 = vst [vmem:[%s286_s19] sm:$0xf] %v640_v29 }
 0x322   : > { %v772_v30 = vpop.f32.mrf.mxu1 }
 0x323 PF: > { %s15_s22 = sadd.s32 1, %s861_s22   ;;  %s1022_s18 = smov %s853_s20 }
 0x324   : > { %p12_p7 = scmp.ge.s32.totalorder %s15_s22, 6   ;;  %s1023_s19 = smov %s857_s21 }
 0x325   : > { %s1024_s20 = smov %s1027_s23  ;;  %s1025_s21 = smov %s1031_s24 }
 0x326   :  { %14 = sbr.rel (!%p12_p7) target bundleno = 3 (0x3), region = 73 }

</bundles_post_ra>
